<compile_context>
chip_gen: v5e
topology: v5e:2x2
jax: 0.10.0
libtpu: 0.0.40
codegen_flags: <defaults>
</compile_context>

<pallas_src>
import numpy as np
import jax
import jax.numpy as jnp
from jax.experimental import pallas as pl
from jax.experimental.pallas import tpu as pltpu


_MASK_BIAS = -1e9     # additive softmax bias for non-edges (kept in f32 inside the kernel)


def _vmem_limit_bytes():
    """~3/4 of physical VMEM (96 MiB on v5e/v6e, 48 MiB on v7x), v7x-safe fallback."""
    try:
        cap = getattr(pltpu.get_tpu_info(), "vmem_capacity_bytes", None)
        if cap:
            return int(min(cap * 3 // 4, 100 * 1024 * 1024))
    except Exception:
        pass
    return 48 * 1024 * 1024


def _target_tile(n):
    """Target (i) axis tile: only ever a sublane block dim -> multiple of 8 or full.
    Prefer >=2 tiles so the 'parallel' grid axis can feed both v7x TensorCores."""
    if n % 128 == 0 and n > 128:
        return 128
    if n % 16 == 0 and n > 8:
        return n // 2
    return n


def _source_tile(n):
    """Source (j) axis tile: lane block dim on edge / mask / xl^T -> 128-multiple or full."""
    return 128 if (n % 128 == 0 and n > 128) else n


def _proj_tile(n):
    for t in (512, 256, 128):
        if n % t == 0:
            return t
    return n


# -----------------------------------------------------------------------------
# Kernel 1: fused lin_l / lin_r projection.   y = x @ [W_l | W_r] + [b_l | b_r]
#   One bf16 MXU matmul covers both projections and every head.
# -----------------------------------------------------------------------------
def _gatv2_proj_kernel(x_ref, w_ref, b_ref, xl_ref, xr_ref):
    hc = xl_ref.shape[1]
    y = jnp.dot(x_ref[...].astype(jnp.bfloat16), w_ref[...],
                preferred_element_type=jnp.float32) + b_ref[...]
    xl_ref[...] = y[:, :hc]
    xr_ref[...] = y[:, hc:]


# -----------------------------------------------------------------------------
# Kernel 2: GATv2 attention + aggregation, flash-style online softmax.
#   grid = (target tiles i ["parallel"], source tiles j ["arbitrary"]).
#   scratch: running max m [Ti, H], denom l [Ti, H], numerator acc [Ti, H*C].
# -----------------------------------------------------------------------------
def _gatv2_attn_kernel(xr_ref, xl_ref, xlt_ref, edge_ref, mask_ref, wet_ref, att_ref,
                       out_ref, m_ref, l_ref, acc_ref):
    ti, hc = xr_ref.shape
    tj = xlt_ref.shape[1]
    e_dim = edge_ref.shape[0]
    heads, c_ch = att_ref.shape
    j = pl.program_id(1)

    @pl.when(j == 0)
    def _init():
        m_ref[...] = jnp.full_like(m_ref, -1e30)
        l_ref[...] = jnp.zeros_like(l_ref)
        acc_ref[...] = jnp.zeros_like(acc_ref)

    # additive softmax bias decoded from the compressed bf16 0/1 adjacency mask (f32)
    bias = jnp.where(mask_ref[...] > 0, 0.0, _MASK_BIAS).astype(jnp.float32)   # [Ti, Tj]

    # edge block [E, Ti, Tj] bf16 -> [E, Ti*Tj] once (small relayout, reused by all heads)
    edge2 = edge_ref[...].reshape(e_dim, ti * tj)

    xr = xr_ref[...]                              # [Ti, HC] f32  targets (i)
    xlt = xlt_ref[...]                            # [HC, Tj] f32  sources (j), lane-dense rows
    xl_b = xl_ref[...].astype(jnp.bfloat16)       # [Tj, HC] bf16 aggregation operand
    att = att_ref[...]                            # [H, C]   f32

    pv_parts, corr_parts = [], []
    for h in range(heads):                        # static unroll over heads
        lo = h * c_ch

        # per-head edge projection on the MXU (K = e_dim) -> lane-dense [C, Ti, Tj] slabs
        ep = jnp.dot(wet_ref[lo:lo + c_ch, :], edge2,
                     preferred_element_type=jnp.float32).reshape(c_ch, ti, tj)

        # GATv2 score: lane-dense [Ti, Tj] accumulation over channels (VPU-friendly)
        logits = bias
        for c in range(c_ch):
            idx = lo + c
            s = ep[c] + xlt[idx:idx + 1, :] + xr[:, idx:idx + 1]
            s = jnp.maximum(s, 0.2 * s)                           # LeakyReLU(0.2)
            logits = logits + att[h:h + 1, c:c + 1] * s

        # flash-style online softmax over the streamed source axis j
        m_prev = m_ref[:, h:h + 1]                                # [Ti, 1]
        m_new = jnp.maximum(m_prev, jnp.max(logits, axis=-1, keepdims=True))
        corr = jnp.exp(m_prev - m_new)
        p = jnp.exp(logits - m_new)                               # [Ti, Tj]
        l_ref[:, h:h + 1] = corr * l_ref[:, h:h + 1] + jnp.sum(p, axis=-1, keepdims=True)
        m_ref[:, h:h + 1] = m_new

        # weighted aggregation on the MXU (bf16 operands, f32 accumulation)
        pv_parts.append(jnp.dot(p.astype(jnp.bfloat16), xl_b[:, lo:lo + c_ch],
                                preferred_element_type=jnp.float32))     # [Ti, C]
        corr_parts.append(jnp.broadcast_to(corr, (ti, c_ch)))

    # full-width accumulator update (single unmasked store across all heads)
    pv_all = pv_parts[0] if heads == 1 else jnp.concatenate(pv_parts, axis=1)
    corr_all = corr_parts[0] if heads == 1 else jnp.concatenate(corr_parts, axis=1)
    acc_ref[...] = corr_all * acc_ref[...] + pv_all

    @pl.when(j == pl.num_programs(1) - 1)
    def _finalize():
        inv_l = pl.reciprocal(l_ref[...], approx=False)           # [Ti, H] exact, once/i-tile
        parts = [jnp.broadcast_to(inv_l[:, h:h + 1], (ti, c_ch)) for h in range(heads)]
        inv_all = parts[0] if heads == 1 else jnp.concatenate(parts, axis=1)
        out_ref[...] = (acc_ref[...] * inv_all).astype(out_ref.dtype)     # full-width store


# -----------------------------------------------------------------------------
# One GATv2Conv layer = projection pallas_call + attention pallas_call + glue.
# -----------------------------------------------------------------------------
def gatv2_conv_pallas(x, mask_b, edge_t, prep, *, heads, out_ch, concat):
    n, f_in = x.shape
    hc = heads * out_ch
    e_dim = edge_t.shape[0]
    vmem = _vmem_limit_bytes()

    # --- fused lin_l / lin_r projection -------------------------------------
    tn = _proj_tile(n)
    xl, xr = pl.pallas_call(
        _gatv2_proj_kernel,
        out_shape=(jax.ShapeDtypeStruct((n, hc), jnp.float32),
                   jax.ShapeDtypeStruct((n, hc), jnp.float32)),
        grid_spec=pltpu.PrefetchScalarGridSpec(
            num_scalar_prefetch=0,
            grid=(n // tn,),
            in_specs=[
                pl.BlockSpec((tn, f_in), lambda i: (i, 0)),          # x
                pl.BlockSpec((f_in, 2 * hc), lambda i: (0, 0)),      # [W_l | W_r] (bf16)
                pl.BlockSpec((1, 2 * hc), lambda i: (0, 0)),         # [b_l | b_r] (f32)
            ],
            out_specs=[
                pl.BlockSpec((tn, hc), lambda i: (i, 0)),            # x_l (sources)
                pl.BlockSpec((tn, hc), lambda i: (i, 0)),            # x_r (targets)
            ]),
        compiler_params=pltpu.CompilerParams(
            dimension_semantics=("parallel",), vmem_limit_bytes=vmem),
    )(x, prep["w_lr"], prep["b_lr"])

    # transposed copy of x_l so per-channel source rows are lane-dense in the score math
    xlt = xl.T

    # --- attention + aggregation (online softmax over streamed source tiles) --
    ti = _target_tile(n)
    tj = _source_tile(n)
    out = pl.pallas_call(
        _gatv2_attn_kernel,
        out_shape=jax.ShapeDtypeStruct((n, hc), jnp.float32),
        grid_spec=pltpu.PrefetchScalarGridSpec(
            num_scalar_prefetch=0,
            grid=(n // ti, n // tj),
            in_specs=[
                pl.BlockSpec((ti, hc), lambda i, j: (i, 0)),            # x_r (targets)
                pl.BlockSpec((tj, hc), lambda i, j: (j, 0)),            # x_l (agg operand)
                pl.BlockSpec((hc, tj), lambda i, j: (0, j)),            # x_l^T (score rows)
                pl.BlockSpec((e_dim, ti, tj), lambda i, j: (0, i, j)),  # edge attrs [E,N,N] bf16
                pl.BlockSpec((ti, tj), lambda i, j: (i, j)),            # adjacency mask bf16
                pl.BlockSpec((hc, e_dim), lambda i, j: (0, 0)),         # W_edge^T bf16
                pl.BlockSpec((heads, out_ch), lambda i, j: (0, 0)),     # att f32
            ],
            out_specs=pl.BlockSpec((ti, hc), lambda i, j: (i, 0)),
            scratch_shapes=[
                pltpu.VMEM((ti, heads), jnp.float32),   # running max
                pltpu.VMEM((ti, heads), jnp.float32),   # running denominator
                pltpu.VMEM((ti, hc), jnp.float32),      # running numerator
            ]),
        compiler_params=pltpu.CompilerParams(
            dimension_semantics=("parallel", "arbitrary"),
            vmem_limit_bytes=vmem),
    )(xr, xl, xlt, edge_t, mask_b, prep["wet"], prep["att"])

    # concat (already head-major) / head-mean + layer bias (cheap XLA glue)
    y = out if concat else jnp.mean(out.reshape(n, heads, out_ch), axis=1)
    return y + prep["bias"]


# -----------------------------------------------------------------------------
# Pure-JAX reference (same math + same bf16-operand / f32-accumulate policy).
# -----------------------------------------------------------------------------
def gatv2_conv_ref(x, mask, edge_dense, params, *, heads, out_ch, concat):
    n = x.shape[0]
    wl, bl, wr, br, we, att, bias = params
    h, c = heads, out_ch
    bf = jnp.bfloat16
    xl = jnp.dot(x.astype(bf), wl.astype(bf),
                 preferred_element_type=jnp.float32) + bl.reshape(1, h * c)
    xr = jnp.dot(x.astype(bf), wr.astype(bf),
                 preferred_element_type=jnp.float32) + br.reshape(1, h * c)
    ep = jnp.dot(edge_dense.reshape(n * n, -1).astype(bf), we.astype(bf),
                 preferred_element_type=jnp.float32).reshape(n, n, h, c)
    s = xr.reshape(n, h, c)[:, None] + xl.reshape(n, h, c)[None] + ep
    s = jnp.where(s >= 0.0, s, 0.2 * s)
    logits = jnp.einsum("ijhc,hc->ijh", s, att, precision=jax.lax.Precision.HIGHEST)
    logits = logits + jnp.where(mask > 0.0, 0.0, _MASK_BIAS)[:, :, None]
    alpha = jax.nn.softmax(logits, axis=1)
    out = jnp.einsum("ijh,jhc->ihc", alpha.astype(bf), xl.reshape(n, h, c).astype(bf),
                     preferred_element_type=jnp.float32)
    y = out.reshape(n, h * c) if concat else out.mean(axis=1)
    return y + bias


# -----------------------------------------------------------------------------
# Graph densification (replicates remove_self_loops + add_self_loops(fill='mean')).
# -----------------------------------------------------------------------------
def build_dense_graph(edge_index, edge_attr, num_nodes):
    src, dst = edge_index[0], edge_index[1]
    n_edges = src.shape[0]
    ed = edge_attr.shape[1]

    mask = jnp.zeros((num_nodes, num_nodes), jnp.float32).at[dst, src].set(1.0)
    dense = jnp.zeros((num_nodes, num_nodes, ed), jnp.float32).at[dst, src].set(edge_attr)

    # self-loop edge attr = mean of edge_attr over edges sharing the same target
    deg = jax.ops.segment_sum(jnp.ones((n_edges,), jnp.float32), dst, num_segments=num_nodes)
    esum = jax.ops.segment_sum(edge_attr, dst, num_segments=num_nodes)
    loop_attr = jnp.where(deg[:, None] > 0, esum / jnp.maximum(deg, 1.0)[:, None], 0.0)

    idx = jnp.arange(num_nodes)
    mask = mask.at[idx, idx].set(1.0)
    dense = dense.at[idx, idx].set(loop_attr)
    return mask, dense


# -----------------------------------------------------------------------------
# Parameter init (deterministic) + kernel-side prep (weight fusion / layout / bf16 cast).
# -----------------------------------------------------------------------------
def _init_gatv2_layer(key, f_in, edge_dim, out_ch, heads, concat):
    k1, k2, k3, k4, k5, k6, k7 = jax.random.split(key, 7)
    s_in = 1.0 / np.sqrt(f_in)
    s_ed = 1.0 / np.sqrt(edge_dim)
    s_c = 1.0 / np.sqrt(out_ch)
    wl = jax.random.normal(k1, (f_in, heads * out_ch), jnp.float32) * s_in
    bl = jax.random.normal(k2, (heads, out_ch), jnp.float32) * 0.01
    wr = jax.random.normal(k3, (f_in, heads * out_ch), jnp.float32) * s_in
    br = jax.random.normal(k4, (heads, out_ch), jnp.float32) * 0.01
    we = jax.random.normal(k5, (edge_dim, heads * out_ch), jnp.float32) * s_ed
    att = jax.random.normal(k6, (heads, out_ch), jnp.float32) * s_c
    bdim = heads * out_ch if concat else out_ch
    bias = jax.random.normal(k7, (bdim,), jnp.float32) * 0.01
    return (wl, bl, wr, br, we, att, bias)


def _prep_gatv2_layer(params):
    wl, bl, wr, br, we, att, bias = params
    hc = wl.shape[1]
    w_lr = jnp.concatenate([wl, wr], axis=1).astype(jnp.bfloat16)             # [F, 2*HC]
    b_lr = jnp.concatenate([bl.reshape(1, hc), br.reshape(1, hc)], axis=1)    # [1, 2*HC] f32
    wet = we.T.astype(jnp.bfloat16)                                           # [HC, E]
    return dict(w_lr=w_lr, b_lr=b_lr, wet=wet, att=att, bias=bias)


class GATv2ModelPallas:
    def __init__(self, key, in_features, edge_dim, hidden_features, out_features,
                 num_heads, num_layers, dropout):
        del dropout  # inference forward: attention dropout is identity
        self.params, self.prepped, self.cfgs = [], [], []
        keys = jax.random.split(key, num_layers)
        f = in_features
        for li in range(num_layers):
            last = (li == num_layers - 1)
            heads = 1 if last else num_heads
            out_ch = out_features if last else hidden_features
            concat = not last
            p = _init_gatv2_layer(keys[li], f, edge_dim, out_ch, heads, concat)
            self.params.append(p)
            self.prepped.append(_prep_gatv2_layer(p))
            self.cfgs.append((heads, out_ch, concat))
            f = heads * out_ch if concat else out_ch

    def __call__(self, x, edge_index, edge_attr):
        n = x.shape[0]
        mask, edge_dense = build_dense_graph(edge_index, edge_attr, n)

        # pad the node count to a 128-multiple only when N > 128 (keeps every lane-axis
        # block either 128-aligned or full-extent); padded sources are masked off.
        n_pad = n if n <= 128 else ((n + 127) // 128) * 128
        if n_pad != n:
            pad = n_pad - n
            x = jnp.pad(x, ((0, pad), (0, 0)))
            mask = jnp.pad(mask, ((0, pad), (0, pad)))
            edge_dense = jnp.pad(edge_dense, ((0, pad), (0, pad), (0, 0)))

        mask_b = mask.astype(jnp.bfloat16)                                   # 0/1 mask stream
        edge_t = jnp.transpose(edge_dense, (2, 0, 1)).astype(jnp.bfloat16)   # [E, N, N] bf16

        h = x
        for prep, (heads, out_ch, concat) in zip(self.prepped, self.cfgs):
            h = gatv2_conv_pallas(h, mask_b, edge_t, prep,
                                  heads=heads, out_ch=out_ch, concat=concat)
            h = jnp.maximum(h, 0.0)  # ReLU after every layer
        return h[:n]

    def reference(self, x, edge_index, edge_attr):
        n = x.shape[0]
        mask, edge_dense = build_dense_graph(edge_index, edge_attr, n)
        for params, (heads, out_ch, concat) in zip(self.params, self.cfgs):
            x = gatv2_conv_ref(x, mask, edge_dense, params,
                               heads=heads, out_ch=out_ch, concat=concat)
            x = jnp.maximum(x, 0.0)
        return x


if __name__ == "__main__":
    key = jax.random.PRNGKey(0)
    N = 16
    in_features, edge_dim = 16, 8
    hidden_features, out_features = 32, 16
    num_heads, num_layers, dropout = 4, 3, 0.1

    k_model, k_x, k_e = jax.random.split(key, 3)
    model = GATv2ModelPallas(k_model, in_features, edge_dim, hidden_features,
                             out_features, num_heads, num_layers, dropout)

    # node features [N, in_features]
    x = jax.random.normal(k_x, (N, in_features), jnp.float32)

    # deterministic graph: edges j -> (j + k) % N for k in {1, 2, 5} (no self-loops, no dups)
    base = jnp.arange(N, dtype=jnp.int32)
    src = jnp.concatenate([base, base, base])
    dst = jnp.concatenate([(base + 1) % N, (base + 2) % N, (base + 5) % N])
    edge_index = jnp.stack([src, dst], axis=0)                 # [2, 48]
    edge_attr = jax.random.normal(k_e, (src.shape[0], edge_dim), jnp.float32)

    out = model(x, edge_index, edge_attr)
    out = jax.block_until_ready(out)
    assert out.shape == (N, out_features)

    ref = model.reference(x, edge_index, edge_attr)
    np.testing.assert_allclose(np.asarray(out), np.asarray(ref), rtol=2e-2, atol=2e-2)

    print("KERNEL_OK")
</pallas_src>

<mosaic_0001>
module attributes {stable_mosaic.version = 11 : i64} {
  func.func @_gatv2_proj_kernel(%arg0: i32, %arg1: memref<16x16xf32, #tpu.memory_space<vmem>>, %arg2: memref<16x256xbf16, #tpu.memory_space<vmem>>, %arg3: memref<1x256xf32, #tpu.memory_space<vmem>>, %arg4: memref<16x128xf32, #tpu.memory_space<vmem>>, %arg5: memref<16x128xf32, #tpu.memory_space<vmem>>) attributes {dimension_semantics = [#tpu.dimension_semantics<parallel>], iteration_bounds = array<i64: 1>, scalar_prefetch = 0 : i64, scratch_operands = 0 : i64, tpu.core_type = #tpu.core_type<tc>, window_params = [{transform_indices = @transform_0, window_bounds = array<i64: 16, 16>}, {pipeline_mode = #tpu.pipeline_mode<synchronous>, transform_indices = @transform_1, window_bounds = array<i64: 16, 256>}, {pipeline_mode = #tpu.pipeline_mode<synchronous>, transform_indices = @transform_2, window_bounds = array<i64: 1, 256>}, {transform_indices = @transform_3, window_bounds = array<i64: 16, 128>}, {transform_indices = @transform_4, window_bounds = array<i64: 16, 128>}]} {
    %c0 = arith.constant 0 : index
    %c0_0 = arith.constant 0 : index
    %0 = vector.load %arg1[%c0, %c0_0] : memref<16x16xf32, #tpu.memory_space<vmem>>, vector<16x16xf32>
    %1 = arith.truncf %0 : vector<16x16xf32> to vector<16x16xbf16>
    %c0_1 = arith.constant 0 : index
    %c0_2 = arith.constant 0 : index
    %2 = vector.load %arg2[%c0_1, %c0_2] : memref<16x256xbf16, #tpu.memory_space<vmem>>, vector<16x256xbf16>
    %cst = arith.constant dense<0.000000e+00> : vector<16x256xf32>
    %3 = tpu.matmul %1, %2, %cst {dimension_numbers = #tpu.dot_dimension_numbers<[1], [0], [0], [1], [0, 0, 1, 1], [], []>} : vector<16x16xbf16>, vector<16x256xbf16>, vector<16x256xf32> -> vector<16x256xf32>
    %c0_3 = arith.constant 0 : index
    %c0_4 = arith.constant 0 : index
    %4 = vector.load %arg3[%c0_3, %c0_4] : memref<1x256xf32, #tpu.memory_space<vmem>>, vector<1x256xf32>
    %5 = vector.broadcast %4 : vector<1x256xf32> to vector<16x256xf32>
    %6 = arith.addf %3, %5 : vector<16x256xf32>
    %7 = vector.extract_strided_slice %6 {offsets = [0, 0], sizes = [16, 128], strides = [1, 1]} : vector<16x256xf32> to vector<16x128xf32>
    %c0_5 = arith.constant 0 : index
    %c0_6 = arith.constant 0 : index
    %8 = vector.load %arg4[%c0_5, %c0_6] : memref<16x128xf32, #tpu.memory_space<vmem>>, vector<16x128xf32>
    tpu.vector_store %arg4[%c0_5, %c0_6], %7 {strides = array<i32>} : memref<16x128xf32, #tpu.memory_space<vmem>>, vector<16x128xf32>,
    %9 = vector.extract_strided_slice %6 {offsets = [0, 128], sizes = [16, 128], strides = [1, 1]} : vector<16x256xf32> to vector<16x128xf32>
    %c0_7 = arith.constant 0 : index
    %c0_8 = arith.constant 0 : index
    %10 = vector.load %arg5[%c0_7, %c0_8] : memref<16x128xf32, #tpu.memory_space<vmem>>, vector<16x128xf32>
    tpu.vector_store %arg5[%c0_7, %c0_8], %9 {strides = array<i32>} : memref<16x128xf32, #tpu.memory_space<vmem>>, vector<16x128xf32>,
    return
  }
  func.func @transform_0(%arg0: i32) -> (i32, i32) {
    %c0_i32 = arith.constant 0 : i32
    %c0_i32_0 = arith.constant 0 : i32
    return %arg0, %c0_i32 : i32, i32
  }
  func.func @transform_1(%arg0: i32) -> (i32, i32) {
    %c0_i32 = arith.constant 0 : i32
    %c0_i32_0 = arith.constant 0 : i32
    %c0_i32_1 = arith.constant 0 : i32
    return %c0_i32, %c0_i32_0 : i32, i32
  }
  func.func @transform_2(%arg0: i32) -> (i32, i32) {
    %c0_i32 = arith.constant 0 : i32
    %c0_i32_0 = arith.constant 0 : i32
    %c0_i32_1 = arith.constant 0 : i32
    return %c0_i32, %c0_i32_0 : i32, i32
  }
  func.func @transform_3(%arg0: i32) -> (i32, i32) {
    %c0_i32 = arith.constant 0 : i32
    %c0_i32_0 = arith.constant 0 : i32
    return %arg0, %c0_i32 : i32, i32
  }
  func.func @transform_4(%arg0: i32) -> (i32, i32) {
    %c0_i32 = arith.constant 0 : i32
    %c0_i32_0 = arith.constant 0 : i32
    return %arg0, %c0_i32 : i32, i32
  }
}

</mosaic_0001>

<bundles_post_ra>
// kernel: tpu_custom_call.1
= control target key start
LH: loop header
LB: loop body
LE: loop exit
PB: predicated region body
PF: predicated region fallthrough
CT: control target
= control target key end

     0   :  { %10 = vsyncpa [#allocation3], 0  ;;  %s365_s0 = inlined_call_operand.hbm [shape: f32[16,16], index: 0, kind: input, shape index: {}]   ;;  %s366_s1 = inlined_call_operand.hbm [shape: bf16[16,256], index: 1, kind: input, shape index: {}]   ;;  %s367_s2 = inlined_call_operand.hbm [shape: f32[1,256], index: 2, kind: input, shape index: {}]   ;;  %s368_s3 = inlined_call_operand.hbm [shape: f32[16,128], index: 3, kind: output, shape index: {0}]   ;;  %s369_s4 = inlined_call_operand.hbm [shape: f32[16,128], index: 4, kind: output, shape index: {1}]  }
   0x1   :  { %11 = vsyncpa [#allocation6], 0 }
   0x2   :  { %12 = vsyncpa [#allocation4], 0 }
   0x3   :  { %13 = vsyncpa [#allocation10], 0  ;;  %s31_s17 = sshll.u32 %s366_s1, 4  ;;  %s306_s18 = smov [#allocation5]   ;;  %s32_s17 = int_to_ptr.hbm [resolvable:$true] %s31_s17 }
   0x4   :  { %s33_s19 = sshll.u32 %s306_s18, 4  ;;  %s18_s22 = sshll.u32 %s365_s0, 4  ;;  %s34_s19 = int_to_ptr.vmem [resolvable:$true] %s33_s19  ;;  %s19_s22 = int_to_ptr.hbm [resolvable:$true] %s18_s22 }
   0x5   :  { %s307_s23 = smov 128   ;;  %s308_s24 = smov 8  }
   0x6   :  { %39 = dma.hbm_to_vmem [thread:$0]  %s32_s17, 256, %s34_s19, [#allocation6], %s307_s23, %s307_s23, %s308_s24  }
   0x7   :  { %s309_s25 = smov [#allocation2]   ;;  %s45_s1 = sshll.u32 %s367_s2, 4  ;;  %s46_s1 = int_to_ptr.hbm [resolvable:$true] %s45_s1 }
   0x8   :  { %s20_s26 = sshll.u32 %s309_s25, 4  ;;  %s310_s0 = smov [#allocation7]   ;;  %s21_s26 = int_to_ptr.vmem [resolvable:$true] %s20_s26 }
   0x9   :  { %26 = dma.hbm_to_vmem [thread:$0]  %s19_s22, 256, %s21_s26, [#allocation3], %s307_s23, %s307_s23, %s308_s24  }
   0xa   :  { %s47_s29 = sshll.u32 %s310_s0, 4  ;;  %s48_s29 = int_to_ptr.vmem [resolvable:$true] %s47_s29 }
   0xb   :  { %50 = dma.hbm_to_vmem [thread:$0]  %s46_s1, 32, %s48_s29, [#allocation6]  }
   0xc   :  { %298 = dma.done.wait [#allocation3], 256  }
   0xd   :  { %299 = vsyncadd [#allocation3], 4294967040 }
   0xe   :  { %300 = dma.done.wait [#allocation6], 288  }
   0xf   :  { %301 = vsyncadd [#allocation6], 4294967008  ;;  %v161_v0 = vld [vmem:[#allocation5] sm:$0xf]  ;;  %v170_v1 = vld [vmem:[#allocation5 + $0x4] sm:$0xf0] }
  0x10   :  { %v169_v2 = vld [vmem:[#allocation5 + $0x4] sm:$0xf]  ;;  %v162_v3 = vor.u32 %v170_v1, %v161_v0  ;;  %v163_v4 = vld [vmem:[#allocation5 + $0x8] sm:$0xf0]  ;;  %v64_v5 = vld [vmem:[#allocation2] sm:$0xff]  ;;  %vm85_vm0 = vcmask 130048  }
  0x11   :  { %v65_v6 = vld [vmem:[#allocation2 + $0x8] sm:$0xff]  ;;  %v166_v7 = vor.u32 %v169_v2, %v163_v4  ;;  %v69_v9 = vld [vmem:[#allocation7] sm:$0x3]  ;;  %s311_s2 = smov [#allocation8]   ;;  %s127_s7 = sshll.u32 %s368_s3, 4  ;;  %s128_s7 = int_to_ptr.hbm [resolvable:$true] %s127_s7 }
  0x12   :  { %v66_v8 = vpack.c.bf16 %v65_v6, %v64_v5  ;;  %96 = vmatpush.bf16.msra.mxu0 %v162_v3  ;;  %v71_v10 = vperm.slane %v69_v9, 0  ;;  %v72_v11 = vperm.slane %v69_v9, 1  ;;  %s125_s30 = sshll.u32 %s311_s2, 4  ;;  %s312_s8 = smov [#allocation9]   ;;  %s126_s30 = int_to_ptr.vmem [resolvable:$true] %s125_s30 }
  0x13   :  { %110 = vmatpush.bf16.msra.mxu1 %v166_v7  ;;  %s138_s9 = sshll.u32 %s312_s8, 4  ;;  %s140_s12 = sshll.u32 %s369_s4, 4  ;;  %s139_s9 = int_to_ptr.vmem [resolvable:$true] %s138_s9  ;;  %s141_s12 = int_to_ptr.hbm [resolvable:$true] %s140_s12 }
  0x15   :  { %167 = vmatmul.msk.bf16.vlgmr.msra.gmra.mxu0 %vm85_vm0, %v66_v8 }
  0x16   :  { %168 = vmatmul.msk.bf16.vlgmr.msra.gmra.mxu1 %vm85_vm0, %v66_v8 }
  0x92   :  { %v98_v12 = vpop.f32.mrf.mxu0 }
  0x93   :  { %v99_v13 = vadd.f32 %v98_v12, %v71_v10  ;;  %v112_v14 = vpop.f32.mrf.mxu1 }
  0x94   :  { %v113_v15 = vadd.f32 %v112_v14, %v72_v11 }
  0x95   :  { %117 = vst [vmem:[#allocation8] sm:$0xff] %v99_v13 }
  0x96   :  { %119 = vst [vmem:[#allocation9] sm:$0xff] %v113_v15 }
  0x9a   :  { %v100_v16 = vpop.f32.mrf.mxu0 }
  0x9b   :  { %v101_v17 = vadd.f32 %v100_v16, %v71_v10  ;;  %v114_v18 = vpop.f32.mrf.mxu1 }
  0x9c   :  { %v115_v19 = vadd.f32 %v114_v18, %v72_v11 }
  0x9d   :  { %118 = vst [vmem:[#allocation8 + $0x8] sm:$0xff] %v101_v17 }
  0x9e   :  { %120 = vst [vmem:[#allocation9 + $0x8] sm:$0xff] %v115_v19  ;;  %133 = dma.vmem_to_hbm [thread:$0]  %s126_s30, 256, %s128_s7, [#allocation4], %s307_s23, %s307_s23, %s308_s24  }
  0x9f   :  { %146 = dma.vmem_to_hbm [thread:$0]  %s139_s9, 256, %s141_s12, [#allocation10], %s307_s23, %s307_s23, %s308_s24  }
  0xa0   :  { %302 = dma.done.wait [#allocation4], 256  }
  0xa1   :  { %303 = vsyncadd [#allocation4], 4294967040 }
  0xa2   :  { %304 = dma.done.wait [#allocation10], 256  }
  0xa3   :  { %305 = vsyncadd [#allocation10], 4294967040 }
  0xa4   :  { %155 = vsyncpa [#allocation3], 1 }
  0xa5   :  { %156 = vsyncpa [#allocation6], 1 }
  0xa6   :  { %157 = vsyncpa [#allocation4], 1 }
  0xa7   :  { %158 = vsyncpa [#allocation10], 1 }

</bundles_post_ra>
